<compile_context>
chip_gen: v7x
topology: tpu7x:2x2x1
jax: 0.10.0
libtpu: 0.0.40
codegen_flags: <defaults>
</compile_context>

<pallas_src>
from functools import partial

import numpy as np
import jax
import jax.numpy as jnp
from jax import lax
from jax.experimental import pallas as pl
from jax.experimental.pallas import tpu as pltpu


def _make_kernel(num_hards, temp, proxy_unit_norm):
    # Plain Python floats only: jnp scalars created outside the kernel body become
    # captured device constants and pallas_call rejects them ("captures constants").
    NEG_INF = -1e30
    MASK_OFFSET = 9999999.0          # same constant the torch code uses
    inv_temp = 1.0 / temp

    def kernel(x_ref, pt_ref, tgt_ref, cam_ref, pid_ref, cid_ref, out_ref):
        x = x_ref[...]                                                  # (TB, D) f32

        # F.normalize(dim=1, eps=1e-12); 1/temp folded into the row scale so the
        # (TB, N) sims never need a separate scaling pass (rsqrt runs on the EUP slot).
        inv_norm = lax.rsqrt(
            jnp.maximum(jnp.sum(x * x, axis=-1, keepdims=True), 1e-24))
        xn = (x * (inv_norm * inv_temp)).astype(pt_ref.dtype)           # bf16 for MXU

        sims = jnp.dot(xn, pt_ref[...],
                       preferred_element_type=jnp.float32)              # (TB, N) f32

        # (TB,1) vs (1,N) compares -> implicit broadcast, no materialized int32 (TB,N).
        same_pid = tgt_ref[...] == pid_ref[...]                         # (TB, N) bool
        pos_mask = jnp.logical_and(same_pid, cam_ref[...] != cid_ref[...])

        n_pos = jnp.sum(pos_mask.astype(jnp.float32), axis=-1, keepdims=True)  # (TB,1)
        sum_pos = jnp.sum(jnp.where(pos_mask, sims, 0.0), axis=-1, keepdims=True)

        # Softmax shift: lse is shift-invariant, any upper bound works.  With a
        # unit-norm proxy bank |sims| <= 1/temp, so use the static bound and skip a
        # full-width (TB, N) XLU max reduction.
        if proxy_unit_norm:
            shift = inv_temp
        else:
            shift = jnp.max(sims, axis=-1, keepdims=True)

        # torch-style masked scores for the hard-example selection.
        work0 = jnp.where(same_pid, sims - MASK_OFFSET, sims)

        # Unrolled top-`num_hards` argmax-and-suppress: 1 lane reduction + 1 select per
        # step, no carried (TB, N) boolean.  The selected set is recovered afterwards
        # as work == NEG_INF (valid: no entry of work0 can equal -1e30).  Exact ties
        # are suppressed together; identical loss for distinct sims.
        def body(_, work):
            cur = jnp.max(work, axis=-1, keepdims=True)                 # hardest remaining
            return jnp.where(work == cur, NEG_INF, work)

        work = lax.fori_loop(0, num_hards, body, work0, unroll=True)
        sel = work == NEG_INF                                           # hard-selected set

        # Single exp pass + single fused masked lane reduction for the denominator.
        # (Positives and hard-selected entries are disjoint whenever the bank has
        #  >= num_hards true negatives for the row — always true in practice.)
        es = jnp.exp(sims - shift)                                      # (TB, N)
        denom = jnp.sum(jnp.where(jnp.logical_or(pos_mask, sel), es, 0.0),
                        axis=-1, keepdims=True)                         # (TB, 1)

        lse = shift + jnp.log(denom)
        loss = jnp.where(n_pos > 0.0,
                         lse - sum_pos / jnp.maximum(n_pos, 1.0),
                         0.0)
        out_ref[...] = loss                                             # (TB, 1)

    return kernel


def prepare_proxy(proxy, dtype=jnp.bfloat16):
    """One-time bank preparation: cast + transpose to (D, N).

    Keep the prepared bank around and pass it to `inter_cam_proxy_loss`; do NOT
    re-transpose the (possibly large) memory bank on every call.
    """
    return jnp.asarray(proxy, dtype).T                                  # (D, N)


def _resident_spec(shape, index_map):
    # Constant-index blocks never change across grid steps: single-buffer them so the
    # bank takes 1x (not 2x) of its size in VMEM.
    try:
        return pl.BlockSpec(shape, index_map, pipeline_mode=pl.Buffered(1))
    except TypeError:  # older jax without pipeline_mode -> default double buffering
        return pl.BlockSpec(shape, index_map)


def _pad_rows(a, pad, fill):
    if pad == 0:
        return a
    return jnp.concatenate(
        [a, jnp.full((pad,) + a.shape[1:], fill, a.dtype)], axis=0)


@partial(jax.jit,
         static_argnames=("num_hards", "temp", "block_b", "proxy_unit_norm"))
def inter_cam_proxy_loss(inputs, proxy_t, targets, cams, pids, cids,
                         num_hards=50, temp=0.07, block_b=128,
                         proxy_unit_norm=True):
    """proxy_t is the prepared (D, N) bank from `prepare_proxy`."""
    B, D = inputs.shape
    Dp, N = proxy_t.shape
    assert Dp == D, (Dp, D)

    # Batch tile: large enough to fill MXU rows / pack bf16 sublanes / amortize the
    # per-grid-step pipeline overhead, and shaped to satisfy the (8, 128) constraint.
    # Pick block_b to divide the training batch so the padding path is skipped (and,
    # on v7x, so the grid has >= 2 steps and both TensorCores get work).
    if B <= block_b:
        TB = max(8, ((B + 7) // 8) * 8)          # single block covering the batch
    else:
        TB = ((block_b + 127) // 128) * 128
    Bp = ((B + TB - 1) // TB) * TB
    pad = Bp - B

    x = _pad_rows(jnp.asarray(inputs, jnp.float32), pad, 0.0)
    # Padded rows: target -1 -> no positives -> zero loss contribution.
    tgt = _pad_rows(jnp.asarray(targets, jnp.int32), pad, -1).reshape(Bp, 1)
    cam = _pad_rows(jnp.asarray(cams, jnp.int32), pad, 0).reshape(Bp, 1)
    pid2 = jnp.asarray(pids, jnp.int32).reshape(1, N)
    cid2 = jnp.asarray(cids, jnp.int32).reshape(1, N)

    kernel = _make_kernel(num_hards, temp, proxy_unit_norm)

    # Explicit scoped-VMEM budget: single-buffered bf16 bank + double-buffered batch
    # tiles + live (TB, N) f32/bool temporaries, with headroom, capped at v7x's 64 MiB.
    need = (D * N * 2                # bf16 bank, Buffered(1)
            + 2 * N * 4 * 2          # pids / cids (1, N) i32
            + 2 * TB * D * 4         # double-buffered f32 input tiles
            + 2 * 3 * TB * 4         # targets / cams / output tiles
            + 8 * TB * N * 4)        # sims / es / work / masks live at once
    vmem_limit = int(min(max(need + need // 2 + (4 << 20), 32 << 20), 64 << 20))

    # TODO(synk): for banks whose bf16 block exceeds ~12-16 MiB (v7x, 64 MiB VMEM), add
    # an N grid axis ("arbitrary", last) with online-softmax accumulators and a
    # streaming top-num_hards scratch; below that, the single resident block is faster.
    per_row = pl.pallas_call(
        kernel,
        out_shape=jax.ShapeDtypeStruct((Bp, 1), jnp.float32),
        grid=(Bp // TB,),
        in_specs=[
            pl.BlockSpec((TB, D), lambda i: (i, 0)),        # inputs
            _resident_spec((D, N), lambda i: (0, 0)),       # proxy_t (resident, 1-buf)
            pl.BlockSpec((TB, 1), lambda i: (i, 0)),        # targets
            pl.BlockSpec((TB, 1), lambda i: (i, 0)),        # cams
            _resident_spec((1, N), lambda i: (0, 0)),       # pids (resident, 1-buf)
            _resident_spec((1, N), lambda i: (0, 0)),       # cids (resident, 1-buf)
        ],
        # Per-row losses stay (Bp, 1); a lane-major (1, Bp) layout only pays off at
        # much larger batches and would cost an in-kernel sublane->lane relayout here.
        out_specs=pl.BlockSpec((TB, 1), lambda i: (i, 0)),
        compiler_params=pltpu.CompilerParams(
            dimension_semantics=("parallel",),              # 2-TC sharding on v7x
            vmem_limit_bytes=vmem_limit),
    )(x, proxy_t, tgt, cam, pid2, cid2)

    return (jnp.sum(per_row) / B).reshape(1)                # matches torch tensor([loss])


def _reference_loss(inputs, proxy, targets, cams, pids, cids, num_hards, temp):
    """NumPy mirror of the PyTorch forward (for verification)."""
    x = inputs.astype(np.float64)
    p = proxy.astype(np.float64)
    xn = x / np.maximum(np.linalg.norm(x, axis=1, keepdims=True), 1e-12)
    sims = xn @ p.T / temp
    B = x.shape[0]
    loss = 0.0
    for i in range(B):
        pos_mask = (targets[i] == pids) & (cams[i] != cids)
        neg_mask = (targets[i] != pids)
        pos_idx = np.nonzero(pos_mask)[0]
        if len(pos_idx) == 0:
            continue
        masked = sims[i] + (-9999999.0) * (1.0 - neg_mask.astype(np.float64))
        hard_idx = np.argsort(-masked, kind="stable")[:num_hards]
        sel = np.concatenate([sims[i][pos_idx], sims[i][hard_idx]])
        t = np.zeros(len(sel))
        t[: len(pos_idx)] = 1.0 / len(pos_idx)
        m = sel.max()
        logsm = sel - (m + np.log(np.sum(np.exp(sel - m))))
        loss += -(t * logsm).sum()
    return loss / B


if __name__ == "__main__":
    B, D, N = 32, 64, 256          # batch, num_features, num_samples
    NUM_HARDS, TEMP = 8, 0.07

    key = jax.random.PRNGKey(0)
    k1, k2, k3, k4, k5, k6 = jax.random.split(key, 6)
    inputs = jax.random.normal(k1, (B, D), jnp.float32)
    proxy = jax.random.normal(k2, (N, D), jnp.float32)
    proxy = proxy / jnp.linalg.norm(proxy, axis=1, keepdims=True)   # unit-norm proxies
    pids = jax.random.randint(k3, (N,), 0, 8, jnp.int32)
    cids = jax.random.randint(k4, (N,), 0, 4, jnp.int32)
    targets = jax.random.randint(k5, (B,), 0, 8, jnp.int32)
    cams = jax.random.randint(k6, (B,), 0, 4, jnp.int32)

    proxy_t = prepare_proxy(proxy)          # one-time (D, N) bf16 bank

    loss = inter_cam_proxy_loss(inputs, proxy_t, targets, cams, pids, cids,
                                num_hards=NUM_HARDS, temp=TEMP)
    loss = jax.block_until_ready(loss)

    ref = _reference_loss(np.asarray(inputs), np.asarray(proxy),
                          np.asarray(targets), np.asarray(cams),
                          np.asarray(pids), np.asarray(cids),
                          NUM_HARDS, TEMP)
    assert np.allclose(float(np.asarray(loss)[0]), ref, rtol=5e-2, atol=5e-2), (loss, ref)
    print("KERNEL_OK")
</pallas_src>

<mosaic_0001>
module attributes {stable_mosaic.version = 11 : i64} {
  func.func @kernel(%arg0: i32, %arg1: memref<32x64xf32, #tpu.memory_space<vmem>>, %arg2: memref<64x256xbf16, #tpu.memory_space<vmem>>, %arg3: memref<32x1xi32, #tpu.memory_space<vmem>>, %arg4: memref<32x1xi32, #tpu.memory_space<vmem>>, %arg5: memref<1x256xi32, #tpu.memory_space<vmem>>, %arg6: memref<1x256xi32, #tpu.memory_space<vmem>>, %arg7: memref<32x1xf32, #tpu.memory_space<vmem>>) attributes {dimension_semantics = [#tpu.dimension_semantics<parallel>], iteration_bounds = array<i64: 1>, scalar_prefetch = 0 : i64, scratch_operands = 0 : i64, tpu.core_type = #tpu.core_type<tc>, window_params = [{transform_indices = @transform_0, window_bounds = array<i64: 32, 64>}, {pipeline_mode = #tpu.pipeline_mode<synchronous>, transform_indices = @transform_1, window_bounds = array<i64: 64, 256>}, {transform_indices = @transform_2, window_bounds = array<i64: 32, 1>}, {transform_indices = @transform_3, window_bounds = array<i64: 32, 1>}, {pipeline_mode = #tpu.pipeline_mode<synchronous>, transform_indices = @transform_4, window_bounds = array<i64: 1, 256>}, {pipeline_mode = #tpu.pipeline_mode<synchronous>, transform_indices = @transform_5, window_bounds = array<i64: 1, 256>}, {transform_indices = @transform_6, window_bounds = array<i64: 32, 1>}]} {
    %c0 = arith.constant 0 : index
    %c0_0 = arith.constant 0 : index
    %0 = vector.load %arg1[%c0, %c0_0] : memref<32x64xf32, #tpu.memory_space<vmem>>, vector<32x64xf32>
    %1 = arith.mulf %0, %0 : vector<32x64xf32>
    %cst = arith.constant dense<0.000000e+00> : vector<32xf32>
    %2 = vector.multi_reduction <add>, %1, %cst [1] : vector<32x64xf32> to vector<32xf32>
    %3 = vector.shape_cast %2 : vector<32xf32> to vector<32x1xf32>
    %cst_1 = arith.constant 1.000000e-24 : f32
    %4 = vector.broadcast %cst_1 : f32 to vector<32x1xf32>
    %5 = arith.maximumf %3, %4 : vector<32x1xf32>
    %6 = math.rsqrt %5 : vector<32x1xf32>
    %cst_2 = arith.constant 14.2857141 : f32
    %7 = vector.broadcast %cst_2 : f32 to vector<32x1xf32>
    %8 = arith.mulf %6, %7 : vector<32x1xf32>
    %9 = vector.broadcast %8 : vector<32x1xf32> to vector<32x64xf32>
    %10 = arith.mulf %0, %9 : vector<32x64xf32>
    %11 = arith.truncf %10 : vector<32x64xf32> to vector<32x64xbf16>
    %c0_3 = arith.constant 0 : index
    %c0_4 = arith.constant 0 : index
    %12 = vector.load %arg2[%c0_3, %c0_4] : memref<64x256xbf16, #tpu.memory_space<vmem>>, vector<64x256xbf16>
    %cst_5 = arith.constant dense<0.000000e+00> : vector<32x256xf32>
    %13 = tpu.matmul %11, %12, %cst_5 {dimension_numbers = #tpu.dot_dimension_numbers<[1], [0], [0], [1], [0, 0, 1, 1], [], []>} : vector<32x64xbf16>, vector<64x256xbf16>, vector<32x256xf32> -> vector<32x256xf32>
    %c0_6 = arith.constant 0 : index
    %c0_7 = arith.constant 0 : index
    %14 = vector.load %arg3[%c0_6, %c0_7] : memref<32x1xi32, #tpu.memory_space<vmem>>, vector<32x1xi32>
    %c0_8 = arith.constant 0 : index
    %c0_9 = arith.constant 0 : index
    %15 = vector.load %arg5[%c0_8, %c0_9] : memref<1x256xi32, #tpu.memory_space<vmem>>, vector<1x256xi32>
    %16 = vector.broadcast %14 : vector<32x1xi32> to vector<32x256xi32>
    %17 = vector.broadcast %15 : vector<1x256xi32> to vector<32x256xi32>
    %18 = arith.cmpi eq, %16, %17 : vector<32x256xi32>
    %c0_10 = arith.constant 0 : index
    %c0_11 = arith.constant 0 : index
    %19 = vector.load %arg4[%c0_10, %c0_11] : memref<32x1xi32, #tpu.memory_space<vmem>>, vector<32x1xi32>
    %c0_12 = arith.constant 0 : index
    %c0_13 = arith.constant 0 : index
    %20 = vector.load %arg6[%c0_12, %c0_13] : memref<1x256xi32, #tpu.memory_space<vmem>>, vector<1x256xi32>
    %21 = vector.broadcast %19 : vector<32x1xi32> to vector<32x256xi32>
    %22 = vector.broadcast %20 : vector<1x256xi32> to vector<32x256xi32>
    %23 = arith.cmpi ne, %21, %22 : vector<32x256xi32>
    %24 = arith.andi %18, %23 : vector<32x256xi1>
    %25 = arith.extui %24 : vector<32x256xi1> to vector<32x256xi32>
    %26 = arith.sitofp %25 : vector<32x256xi32> to vector<32x256xf32>
    %cst_14 = arith.constant dense<0.000000e+00> : vector<32xf32>
    %27 = vector.multi_reduction <add>, %26, %cst_14 [1] : vector<32x256xf32> to vector<32xf32>
    %28 = vector.shape_cast %27 : vector<32xf32> to vector<32x1xf32>
    %cst_15 = arith.constant 0.000000e+00 : f32
    %29 = vector.broadcast %cst_15 : f32 to vector<32x256xf32>
    %30 = arith.select %24, %13, %29 : vector<32x256xi1>, vector<32x256xf32>
    %cst_16 = arith.constant dense<0.000000e+00> : vector<32xf32>
    %31 = vector.multi_reduction <add>, %30, %cst_16 [1] : vector<32x256xf32> to vector<32xf32>
    %32 = vector.shape_cast %31 : vector<32xf32> to vector<32x1xf32>
    %cst_17 = arith.constant 0x4B18967F : f32
    %33 = vector.broadcast %cst_17 : f32 to vector<32x256xf32>
    %34 = arith.subf %13, %33 : vector<32x256xf32>
    %35 = arith.select %18, %34, %13 : vector<32x256xi1>, vector<32x256xf32>
    %c0_i32 = arith.constant 0 : i32
    %cst_18 = arith.constant dense<0xFF800000> : vector<32xf32>
    %36 = vector.multi_reduction <maximumf>, %35, %cst_18 [1] : vector<32x256xf32> to vector<32xf32>
    %37 = vector.shape_cast %36 : vector<32xf32> to vector<32x1xf32>
    %38 = vector.broadcast %37 : vector<32x1xf32> to vector<32x256xf32>
    %39 = arith.cmpf oeq, %35, %38 : vector<32x256xf32>
    %cst_19 = arith.constant -1.000000e+30 : f32
    %40 = vector.broadcast %cst_19 : f32 to vector<32x256xf32>
    %41 = arith.select %39, %40, %35 : vector<32x256xi1>, vector<32x256xf32>
    %c1_i32 = arith.constant 1 : i32
    %cst_20 = arith.constant dense<0xFF800000> : vector<32xf32>
    %42 = vector.multi_reduction <maximumf>, %41, %cst_20 [1] : vector<32x256xf32> to vector<32xf32>
    %43 = vector.shape_cast %42 : vector<32xf32> to vector<32x1xf32>
    %44 = vector.broadcast %43 : vector<32x1xf32> to vector<32x256xf32>
    %45 = arith.cmpf oeq, %41, %44 : vector<32x256xf32>
    %cst_21 = arith.constant -1.000000e+30 : f32
    %46 = vector.broadcast %cst_21 : f32 to vector<32x256xf32>
    %47 = arith.select %45, %46, %41 : vector<32x256xi1>, vector<32x256xf32>
    %c2_i32 = arith.constant 2 : i32
    %cst_22 = arith.constant dense<0xFF800000> : vector<32xf32>
    %48 = vector.multi_reduction <maximumf>, %47, %cst_22 [1] : vector<32x256xf32> to vector<32xf32>
    %49 = vector.shape_cast %48 : vector<32xf32> to vector<32x1xf32>
    %50 = vector.broadcast %49 : vector<32x1xf32> to vector<32x256xf32>
    %51 = arith.cmpf oeq, %47, %50 : vector<32x256xf32>
    %cst_23 = arith.constant -1.000000e+30 : f32
    %52 = vector.broadcast %cst_23 : f32 to vector<32x256xf32>
    %53 = arith.select %51, %52, %47 : vector<32x256xi1>, vector<32x256xf32>
    %c3_i32 = arith.constant 3 : i32
    %cst_24 = arith.constant dense<0xFF800000> : vector<32xf32>
    %54 = vector.multi_reduction <maximumf>, %53, %cst_24 [1] : vector<32x256xf32> to vector<32xf32>
    %55 = vector.shape_cast %54 : vector<32xf32> to vector<32x1xf32>
    %56 = vector.broadcast %55 : vector<32x1xf32> to vector<32x256xf32>
    %57 = arith.cmpf oeq, %53, %56 : vector<32x256xf32>
    %cst_25 = arith.constant -1.000000e+30 : f32
    %58 = vector.broadcast %cst_25 : f32 to vector<32x256xf32>
    %59 = arith.select %57, %58, %53 : vector<32x256xi1>, vector<32x256xf32>
    %c4_i32 = arith.constant 4 : i32
    %cst_26 = arith.constant dense<0xFF800000> : vector<32xf32>
    %60 = vector.multi_reduction <maximumf>, %59, %cst_26 [1] : vector<32x256xf32> to vector<32xf32>
    %61 = vector.shape_cast %60 : vector<32xf32> to vector<32x1xf32>
    %62 = vector.broadcast %61 : vector<32x1xf32> to vector<32x256xf32>
    %63 = arith.cmpf oeq, %59, %62 : vector<32x256xf32>
    %cst_27 = arith.constant -1.000000e+30 : f32
    %64 = vector.broadcast %cst_27 : f32 to vector<32x256xf32>
    %65 = arith.select %63, %64, %59 : vector<32x256xi1>, vector<32x256xf32>
    %c5_i32 = arith.constant 5 : i32
    %cst_28 = arith.constant dense<0xFF800000> : vector<32xf32>
    %66 = vector.multi_reduction <maximumf>, %65, %cst_28 [1] : vector<32x256xf32> to vector<32xf32>
    %67 = vector.shape_cast %66 : vector<32xf32> to vector<32x1xf32>
    %68 = vector.broadcast %67 : vector<32x1xf32> to vector<32x256xf32>
    %69 = arith.cmpf oeq, %65, %68 : vector<32x256xf32>
    %cst_29 = arith.constant -1.000000e+30 : f32
    %70 = vector.broadcast %cst_29 : f32 to vector<32x256xf32>
    %71 = arith.select %69, %70, %65 : vector<32x256xi1>, vector<32x256xf32>
    %c6_i32 = arith.constant 6 : i32
    %cst_30 = arith.constant dense<0xFF800000> : vector<32xf32>
    %72 = vector.multi_reduction <maximumf>, %71, %cst_30 [1] : vector<32x256xf32> to vector<32xf32>
    %73 = vector.shape_cast %72 : vector<32xf32> to vector<32x1xf32>
    %74 = vector.broadcast %73 : vector<32x1xf32> to vector<32x256xf32>
    %75 = arith.cmpf oeq, %71, %74 : vector<32x256xf32>
    %cst_31 = arith.constant -1.000000e+30 : f32
    %76 = vector.broadcast %cst_31 : f32 to vector<32x256xf32>
    %77 = arith.select %75, %76, %71 : vector<32x256xi1>, vector<32x256xf32>
    %c7_i32 = arith.constant 7 : i32
    %cst_32 = arith.constant dense<0xFF800000> : vector<32xf32>
    %78 = vector.multi_reduction <maximumf>, %77, %cst_32 [1] : vector<32x256xf32> to vector<32xf32>
    %79 = vector.shape_cast %78 : vector<32xf32> to vector<32x1xf32>
    %80 = vector.broadcast %79 : vector<32x1xf32> to vector<32x256xf32>
    %81 = arith.cmpf oeq, %77, %80 : vector<32x256xf32>
    %cst_33 = arith.constant -1.000000e+30 : f32
    %82 = vector.broadcast %cst_33 : f32 to vector<32x256xf32>
    %83 = arith.select %81, %82, %77 : vector<32x256xi1>, vector<32x256xf32>
    %cst_34 = arith.constant -1.000000e+30 : f32
    %84 = vector.broadcast %cst_34 : f32 to vector<32x256xf32>
    %85 = arith.cmpf oeq, %83, %84 : vector<32x256xf32>
    %cst_35 = arith.constant 14.2857141 : f32
    %86 = vector.broadcast %cst_35 : f32 to vector<32x256xf32>
    %87 = arith.subf %13, %86 : vector<32x256xf32>
    %88 = math.exp %87 : vector<32x256xf32>
    %89 = arith.ori %24, %85 : vector<32x256xi1>
    %cst_36 = arith.constant 0.000000e+00 : f32
    %90 = vector.broadcast %cst_36 : f32 to vector<32x256xf32>
    %91 = arith.select %89, %88, %90 : vector<32x256xi1>, vector<32x256xf32>
    %cst_37 = arith.constant dense<0.000000e+00> : vector<32xf32>
    %92 = vector.multi_reduction <add>, %91, %cst_37 [1] : vector<32x256xf32> to vector<32xf32>
    %93 = vector.shape_cast %92 : vector<32xf32> to vector<32x1xf32>
    %94 = math.log %93 : vector<32x1xf32>
    %cst_38 = arith.constant 14.2857141 : f32
    %95 = vector.broadcast %cst_38 : f32 to vector<32x1xf32>
    %96 = arith.addf %95, %94 : vector<32x1xf32>
    %cst_39 = arith.constant 0.000000e+00 : f32
    %97 = vector.broadcast %cst_39 : f32 to vector<32x1xf32>
    %98 = arith.cmpf ogt, %28, %97 : vector<32x1xf32>
    %cst_40 = arith.constant 1.000000e+00 : f32
    %99 = vector.broadcast %cst_40 : f32 to vector<32x1xf32>
    %100 = arith.maximumf %28, %99 : vector<32x1xf32>
    %101 = arith.divf %32, %100 : vector<32x1xf32>
    %102 = arith.subf %96, %101 : vector<32x1xf32>
    %cst_41 = arith.constant 0.000000e+00 : f32
    %103 = vector.broadcast %cst_41 : f32 to vector<32x1xf32>
    %104 = arith.select %98, %102, %103 : vector<32x1xi1>, vector<32x1xf32>
    %c0_42 = arith.constant 0 : index
    %c0_43 = arith.constant 0 : index
    %105 = vector.load %arg7[%c0_42, %c0_43] : memref<32x1xf32, #tpu.memory_space<vmem>>, vector<32x1xf32>
    tpu.vector_store %arg7[%c0_42, %c0_43], %104 {strides = array<i32>} : memref<32x1xf32, #tpu.memory_space<vmem>>, vector<32x1xf32>,
    return
  }
  func.func @transform_0(%arg0: i32) -> (i32, i32) {
    %c0_i32 = arith.constant 0 : i32
    %c0_i32_0 = arith.constant 0 : i32
    return %arg0, %c0_i32 : i32, i32
  }
  func.func @transform_1(%arg0: i32) -> (i32, i32) {
    %c0_i32 = arith.constant 0 : i32
    %c0_i32_0 = arith.constant 0 : i32
    %c0_i32_1 = arith.constant 0 : i32
    return %c0_i32, %c0_i32_0 : i32, i32
  }
  func.func @transform_2(%arg0: i32) -> (i32, i32) {
    %c0_i32 = arith.constant 0 : i32
    %c0_i32_0 = arith.constant 0 : i32
    return %arg0, %c0_i32 : i32, i32
  }
  func.func @transform_3(%arg0: i32) -> (i32, i32) {
    %c0_i32 = arith.constant 0 : i32
    %c0_i32_0 = arith.constant 0 : i32
    return %arg0, %c0_i32 : i32, i32
  }
  func.func @transform_4(%arg0: i32) -> (i32, i32) {
    %c0_i32 = arith.constant 0 : i32
    %c0_i32_0 = arith.constant 0 : i32
    %c0_i32_1 = arith.constant 0 : i32
    return %c0_i32, %c0_i32_0 : i32, i32
  }
  func.func @transform_5(%arg0: i32) -> (i32, i32) {
    %c0_i32 = arith.constant 0 : i32
    %c0_i32_0 = arith.constant 0 : i32
    %c0_i32_1 = arith.constant 0 : i32
    return %c0_i32, %c0_i32_0 : i32, i32
  }
  func.func @transform_6(%arg0: i32) -> (i32, i32) {
    %c0_i32 = arith.constant 0 : i32
    %c0_i32_0 = arith.constant 0 : i32
    return %arg0, %c0_i32 : i32, i32
  }
}

</mosaic_0001>

<bundles_post_ra>
// kernel: inter_cam_proxy_loss.1
= control target key start
LH: loop header
LB: loop body
LE: loop exit
PB: predicated region body
PF: predicated region fallthrough
CT: control target
= control target key end

     0   :  { %11 = vsyncpa [#allocation3], 0  ;;  %s777_s21 = smov [#allocation2]   ;;  %s1220_s0 = inlined_call_operand.hbm [shape: f32[32,64], index: 0, kind: input, shape index: {}]   ;;  %s1221_s1 = inlined_call_operand.vmem [shape: bf16[64,256], index: 1, kind: input, shape index: {}]   ;;  %s1222_s2 = inlined_call_operand.vmem [shape: s32[32,1], index: 2, kind: input, shape index: {}]   ;;  %s1223_s3 = inlined_call_operand.vmem [shape: s32[32,1], index: 3, kind: input, shape index: {}]   ;;  %s1224_s4 = inlined_call_operand.vmem [shape: s32[1,256], index: 4, kind: input, shape index: {}]   ;;  %s1225_s5 = inlined_call_operand.vmem [shape: s32[1,256], index: 5, kind: input, shape index: {}]   ;;  %s1226_s6 = inlined_call_operand.vmem [shape: f32[32,1], index: 6, kind: output, shape index: {}]  }
   0x1   :  { %s17_s22 = sshll.u32 %s777_s21, 4  ;;  %s753_s25 = scalar_lea.hbm %s1220_s0, 512  ;;  %s18_s22 = int_to_ptr.vmem [resolvable:$true] %s17_s22 }
   0x2   :  { %p754_p0 = scmp.ne.s32.totalorder %s1220_s0, %s753_s25  ;;  %p757_p1 = scmp.lt.u32.totalorder %s753_s25, %s1220_s0 }
   0x4   :  { %p759_p2 = pnand %p757_p1, %p754_p0 }
   0x6   :  { %762 = shalt.err (!%p759_p2)
}
   0x7   :  { %s763_s30 = scalar_lea.vmem %s18_s22, 512  ;;  %p768_p4 = scmp.lt.s32.totalorder %s18_s22, %s18_s22 }
   0x8   :  { %p764_p3 = scmp.ne.s32.totalorder %s18_s22, %s763_s30  ;;  %p769_p5 = scmp.lt.s32.totalorder %s763_s30, %s763_s30 }
   0xa   :  { %p770_p6 = por %p769_p5, %p768_p4 }
   0xc   :  { %p771_p7 = pnand %p770_p6, %p764_p3 }
   0xe   :  { %774 = shalt.err (!%p771_p7)
}
   0xf   :  { %s778_s7 = smov 128   ;;  %s779_s8 = smov 8  }
  0x10   :  { %23 = dma.hbm_to_vmem [thread:$0]  %s1220_s0, 512, %s18_s22, [#allocation3], %s778_s7, %s778_s7, %s779_s8  }
  0x11   :  { %775 = dma.done.wait [#allocation3], 512  }
  0x12   :  { %776 = vsyncadd [#allocation3], 4294966784  ;;  %v829_v0 = vld [vmem:[#allocation2 + $0x10] sm:$0xff]  ;;  %vm46_vm0 = vcmask 523264   ;;  %v831_v1 = vld [vmem:[#allocation2] sm:$0xff]  ;;  %v780_v20 = vmov 0   ;;  %v201_v47 = vlaneseq }
  0x13   :  { %v833_v2 = vld [vmem:[#allocation2 + $0x18] sm:$0xff]  ;;  %v44_v3 = vmul.f32 %v829_v0, %v829_v0  ;;  %v42_v4 = vmul.f32 %v831_v1, %v831_v1  ;;  %v841_v6 = vld [vmem:[#allocation2 + $0x8] sm:$0xff]  ;;  %163 = vmatprep.mubr.bf16.mxu0 %v780_v20  ;;  %173 = vmatprep.mubr.bf16.mxu1 %v780_v20  ;;  %v184_v22 = vld [vmem:[%s1222_s2] sm:$0xff] }
  0x14   :  { %v45_v5 = vmul.f32 %v833_v2, %v833_v2  ;;  %v43_v7 = vmul.f32 %v841_v6, %v841_v6  ;;  %v701_v12 = vld [vmem:[%s1221_s1 + $0x4] ss:$8 sps:$4 sm:$0xff]   ;;  %v703_v13 = vld [vmem:[%s1221_s1] ss:$8 sps:$4 sm:$0xff]   ;;  %v704_v14 = vld [vmem:[%s1221_s1 + $0x14] ss:$8 sps:$4 sm:$0xff]   ;;  %700 = vset.pattern.permute.xlu1 %v780_v20  ;;  %699 = vset.pattern.permute.xlu0 %v780_v20 }
  0x15   :  { %v53_v8 = vsel %vm46_vm0, %v44_v3, 0.0  ;;  %v47_v9 = vsel %vm46_vm0, %v42_v4, 0.0  ;;  %131 = vmatprep.subr.bf16.mxu0 %v701_v12  ;;  %686 = vmatprep.subr.bf16.mxu1 %v701_v12  ;;  %v706_v15 = vld [vmem:[%s1221_s1 + $0x10] ss:$8 sps:$4 sm:$0xff]   ;;  %v707_v16 = vld [vmem:[%s1221_s1 + $0x24] ss:$8 sps:$4 sm:$0xff]  }
  0x16   :  { %54 = vadd.xlane.f32.xlu1 %v53_v8  ;;  %48 = vadd.xlane.f32.xlu0 %v47_v9  ;;  %v56_v10 = vsel %vm46_vm0, %v45_v5, 0.0  ;;  %v50_v11 = vsel %vm46_vm0, %v43_v7, 0.0  ;;  %v709_v17 = vld [vmem:[%s1221_s1 + $0x20] ss:$8 sps:$4 sm:$0xff]   ;;  %v710_v18 = vld [vmem:[%s1221_s1 + $0x34] ss:$8 sps:$4 sm:$0xff]  }
  0x17   :  { %132 = vmatpush1.bf16.msra.mxu0 %v703_v13  ;;  %690 = vmatpush1.bf16.msra.mxu1 %v703_v13  ;;  %v712_v19 = vld [vmem:[%s1221_s1 + $0x30] ss:$8 sps:$4 sm:$0xff]   ;;  %v185_v21 = vld [vmem:[%s1222_s2 + $0x8] sm:$0xff]  ;;  %v891_v48 = vshrl.u32 %v201_v47, 7  ;;  %v188_v51 = vld [vmem:[%s1224_s4] sm:$0x3] }
  0x18   :  { %133 = vmatprep.subr.bf16.mxu0 %v704_v14  ;;  %687 = vmatprep.subr.bf16.mxu1 %v704_v14  ;;  %v186_v23 = vld [vmem:[%s1222_s2 + $0x10] sm:$0xff]  ;;  %v187_v24 = vld [vmem:[%s1222_s2 + $0x18] sm:$0xff] }
  0x19   :  { %v203_v49 = vsub.s32 0, %v891_v48  ;;  %v207_v52 = vsub.s32 1, %v891_v48 }
  0x1a   :  { %57 = vadd.xlane.f32.xlu1 %v56_v10  ;;  %51 = vadd.xlane.f32.xlu0 %v50_v11 }
  0x1b   :  { %134 = vmatpush1.bf16.msra.mxu0 %v706_v15  ;;  %691 = vmatpush1.bf16.msra.mxu1 %v706_v15  ;;  %v902_v53 = vrot.slane %v188_v51, %v203_v49  ;;  %v906_v54 = vrot.slane %v188_v51, %v207_v52 }
  0x1c   :  { %135 = vmatprep.subr.bf16.mxu0 %v707_v16  ;;  %688 = vmatprep.subr.bf16.mxu1 %v707_v16 }
  0x1f   :  { %136 = vmatpush1.bf16.msra.mxu0 %v709_v17  ;;  %692 = vmatpush1.bf16.msra.mxu1 %v709_v17 }
  0x20   :  { %137 = vmatprep.subr.bf16.mxu0 %v710_v18  ;;  %689 = vmatprep.subr.bf16.mxu1 %v710_v18 }
  0x23   :  { %138 = vmatpush1.bf16.msra.mxu0 %v712_v19  ;;  %693 = vmatpush1.bf16.msra.mxu1 %v712_v19 }
  0x2b   :  { %193 = vperm.xlu1 %700, %v185_v21  }
  0x2f   :  { %196 = vperm.xlu1 %700, %v186_v23  }
  0x30   :  { %190 = vperm.xlu0 %699, %v184_v22  }
  0x33   :  { %199 = vperm.xlu1 %700, %v187_v24  }
  0xa3   :  { %v55_v25 = vpop.xlane.xlu1 %54  ;;  %v49_v26 = vpop.xlane.xlu0 %48 }
  0xa4   :  { %v61_v27 = vmax.f32 %v55_v25, 1e-24  ;;  %v59_v28 = vmax.f32 %v49_v26, 1e-24 }
  0xa6   :  { %713 = vrsqrt.f32 %v61_v27 }
  0xa7   :  { %715 = vrsqrt.f32 %v59_v28  ;;  %v58_v29 = vpop.xlane.xlu1 %57  ;;  %v52_v30 = vpop.xlane.xlu0 %51 }
  0xa8   :  { %v62_v31 = vmax.f32 %v58_v29, 1e-24  ;;  %v60_v32 = vmax.f32 %v52_v30, 1e-24 }
  0xaa   :  { %717 = vrsqrt.f32 %v62_v31 }
  0xab   :  { %719 = vrsqrt.f32 %v60_v32  ;;  %v894_v50 = vpop.permute.xlu1 %193 }
  0xac   :  { %vm211_vm5 = vcmp.eq.s32.totalorder %v894_v50, %v902_v53  ;;  %vm212_vm6 = vcmp.eq.s32.totalorder %v894_v50, %v906_v54 }
  0xaf   :  { %v908_v55 = vpop.permute.xlu0 %190  ;;  %v910_v56 = vpop.permute.xlu1 %196 }
  0xb0   :  { %v714_v33 = vpop.eup %713  ;;  %vm209_vm1 = vcmp.eq.s32.totalorder %v908_v55, %v902_v53  ;;  %vm210_vm2 = vcmp.eq.s32.totalorder %v908_v55, %v906_v54  ;;  %vm213_vm3 = vcmp.eq.s32.totalorder %v910_v56, %v902_v53  ;;  %vm214_vm4 = vcmp.eq.s32.totalorder %v910_v56, %v906_v54  ;;  %v219_v55 = vld [vmem:[%s1223_s3 + $0x10] sm:$0xff] }
  0xb1   :  { %v716_v34 = vpop.eup %715  ;;  %v69_v35 = vmul.f32 14.285714, %v714_v33 }
  0xb2   :  { %v67_v37 = vmul.f32 14.285714, %v716_v34 }
  0xb3   :  { %v73_v39 = vmul.f32 %v69_v35, %v829_v0 }
  0xb4   :  { %v718_v36 = vpop.eup %717  ;;  %v71_v43 = vmul.f32 %v67_v37, %v831_v1 }
  0xb5   :  { %v720_v38 = vpop.eup %719  ;;  %v70_v40 = vmul.f32 14.285714, %v718_v36 }
  0xb6   :  { %v68_v41 = vmul.f32 14.285714, %v720_v38 }
  0xb7   :  { %v74_v42 = vmul.f32 %v70_v40, %v833_v2 }
  0xb8   :  { %v72_v44 = vmul.f32 %v68_v41, %v841_v6  ;;  %v948_v6 = vpop.permute.xlu1 %199 }
  0xb9   :  { %v76_v45 = vpack.c.bf16 %v74_v42, %v73_v39  ;;  %vm215_vm7 = vcmp.eq.s32.totalorder %v948_v6, %v902_v53  ;;  %vm216_vm8 = vcmp.eq.s32.totalorder %v948_v6, %v906_v54 }
  0xba   :  { %v75_v46 = vpack.c.bf16 %v72_v44, %v71_v43 }
  0xbb   :  { %661 = vmatmul.mubr.msk.bf16.vlgmr.msra.gmra.mrb[0].mxu1 %vm46_vm0, %v76_v45 }
  0xbc   :  { %660 = vmatmul.mubr.msk.bf16.vlgmr.msra.gmra.mrb[0].mxu0 %vm46_vm0, %v75_v46 }
 0x18e   :  { %v912_v57 = vpop.f32.mrb[0].mxu1 }
 0x18f   :  { %v914_v58 = vpop.f32.mrb[0].mxu0  ;;  %v916_v59 = vpop.f32.mrb[1].mxu1  ;;  %v674_v0 = vadd.f32 -9999999.0, %v912_v57 }
 0x190   :  { %v670_v60 = vadd.f32 -9999999.0, %v914_v58  ;;  %v919_v61 = vpop.f32.mrb[1].mxu0  ;;  %v923_v62 = vpop.f32.mrb[2].mxu1  ;;  %v675_v1 = vadd.f32 -9999999.0, %v916_v59 }
 0x191   :  { %v671_v63 = vadd.f32 -9999999.0, %v919_v61  ;;  %v938_v3 = vpop.f32.mrb[2].mxu0  ;;  %v940_v4 = vpop.f32.mrb[3].mxu1  ;;  %v318_v10 = vsel %vm213_vm3, %v674_v0, %v912_v57  ;;  %v676_v11 = vadd.f32 -9999999.0, %v923_v62 }
 0x192   :  { %v314_v2 = vsel %vm209_vm1, %v670_v60, %v914_v58  ;;  %v672_v7 = vadd.f32 -9999999.0, %v938_v3  ;;  %v951_v8 = vpop.f32.mrb[3].mxu0  ;;  %v677_v13 = vadd.f32 -9999999.0, %v940_v4  ;;  %v319_v14 = vsel %vm214_vm4, %v675_v1, %v916_v59 }
 0x193   :  { %v315_v5 = vsel %vm210_vm2, %v671_v63, %v919_v61  ;;  %v673_v12 = vadd.f32 -9999999.0, %v951_v8  ;;  %v328_v18 = vmax.f32 %v318_v10, %v319_v14  ;;  %v320_v20 = vsel %vm215_vm7, %v676_v11, %v923_v62 }
 0x194   :  { %v322_v9 = vmax.f32 %v314_v2, %v315_v5  ;;  %v316_v15 = vsel %vm211_vm5, %v672_v7, %v938_v3  ;;  %v321_v19 = vsel %vm216_vm8, %v677_v13, %v940_v4 }
 0x195   :  { %v317_v16 = vsel %vm212_vm6, %v673_v12, %v951_v8  ;;  %v331_v21 = vmax.f32 %v320_v20, %v321_v19 }
 0x196   :  { %323 = vmax.xlane.f32.xlu1 %v322_v9  ;;  %v325_v17 = vmax.f32 %v316_v15, %v317_v16 }
 0x198   :  { %326 = vmax.xlane.f32.xlu0 %v325_v17 }
 0x19a   :  { %329 = vmax.xlane.f32.xlu1 %v328_v18 }
 0x19e   :  { %332 = vmax.xlane.f32.xlu1 %v331_v21 }
 0x223   :  { %v324_v22 = vpop.xlane.xlu1 %323 }
 0x224   :  { %vm334_vm9 = vcmp.eq.f32.partialorder %v314_v2, %v324_v22  ;;  %vm335_vm10 = vcmp.eq.f32.partialorder %v315_v5, %v324_v22 }
 0x225   :  { %v342_v23 = vsel %vm334_vm9, -1e+30, %v314_v2  ;;  %v343_v24 = vsel %vm335_vm10, -1e+30, %v315_v5  ;;  %v327_v26 = vpop.xlane.xlu0 %326 }
 0x226   :  { %v350_v25 = vmax.f32 %v342_v23, %v343_v24  ;;  %vm336_vm11 = vcmp.eq.f32.partialorder %v316_v15, %v327_v26  ;;  %vm337_vm12 = vcmp.eq.f32.partialorder %v317_v16, %v327_v26 }
 0x227   :  { %v330_v27 = vpop.xlane.xlu1 %329  ;;  %v344_v28 = vsel %vm336_vm11, -1e+30, %v316_v15  ;;  %v345_v29 = vsel %vm337_vm12, -1e+30, %v317_v16 }
 0x228   :  { %vm338_vm13 = vcmp.eq.f32.partialorder %v318_v10, %v330_v27  ;;  %vm339_vm14 = vcmp.eq.f32.partialorder %v319_v14, %v330_v27  ;;  %351 = vmax.xlane.f32.xlu1 %v350_v25  ;;  %v353_v32 = vmax.f32 %v344_v28, %v345_v29 }
 0x229   :  { %v346_v30 = vsel %vm338_vm13, -1e+30, %v318_v10  ;;  %v347_v31 = vsel %vm339_vm14, -1e+30, %v319_v14 }
 0x22a   :  { %v356_v34 = vmax.f32 %v346_v30, %v347_v31 }
 0x22b   :  { %v333_v33 = vpop.xlane.xlu1 %332 }
 0x22c   :  { %vm340_vm15 = vcmp.eq.f32.partialorder %v320_v20, %v333_v33  ;;  %vm341_vm0 = vcmp.eq.f32.partialorder %v321_v19, %v333_v33  ;;  %354 = vmax.xlane.f32.xlu1 %v353_v32  ;;  %357 = vmax.xlane.f32.xlu0 %v356_v34 }
 0x22d   :  { %v348_v35 = vsel %vm340_vm15, -1e+30, %v320_v20  ;;  %v349_v36 = vsel %vm341_vm0, -1e+30, %v321_v19 }
 0x22e   :  { %v359_v37 = vmax.f32 %v348_v35, %v349_v36 }
 0x230   :  { %360 = vmax.xlane.f32.xlu1 %v359_v37 }
 0x2b5   :  { %v352_v38 = vpop.xlane.xlu1 %351 }
 0x2b6   :  { %vm362_vm9 = vcmp.eq.f32.partialorder %v342_v23, %v352_v38  ;;  %vm363_vm10 = vcmp.eq.f32.partialorder %v343_v24, %v352_v38 }
 0x2b7   :  { %v370_v39 = vsel %vm362_vm9, -1e+30, %v342_v23  ;;  %v371_v40 = vsel %vm363_vm10, -1e+30, %v343_v24 }
 0x2b8   :  { %v378_v41 = vmax.f32 %v370_v39, %v371_v40 }
 0x2b9   :  { %v355_v42 = vpop.xlane.xlu1 %354  ;;  %v358_v43 = vpop.xlane.xlu0 %357 }
 0x2ba   :  { %vm364_vm11 = vcmp.eq.f32.partialorder %v344_v28, %v355_v42  ;;  %vm365_vm12 = vcmp.eq.f32.partialorder %v345_v29, %v355_v42  ;;  %379 = vmax.xlane.f32.xlu0 %v378_v41  ;;  %vm366_vm13 = vcmp.eq.f32.partialorder %v346_v30, %v358_v43  ;;  %vm367_vm14 = vcmp.eq.f32.partialorder %v347_v31, %v358_v43 }
 0x2bb   :  { %v372_v44 = vsel %vm364_vm11, -1e+30, %v344_v28  ;;  %v373_v45 = vsel %vm365_vm12, -1e+30, %v345_v29  ;;  %v374_v46 = vsel %vm366_vm13, -1e+30, %v346_v30 }
 0x2bc   :  { %v375_v47 = vsel %vm367_vm14, -1e+30, %v347_v31  ;;  %v381_v51 = vmax.f32 %v372_v44, %v373_v45 }
 0x2bd   :  { %v361_v60 = vpop.xlane.xlu1 %360  ;;  %v384_v63 = vmax.f32 %v374_v46, %v375_v47 }
 0x2be   :  { %vm368_vm15 = vcmp.eq.f32.partialorder %v348_v35, %v361_v60  ;;  %vm369_vm0 = vcmp.eq.f32.partialorder %v349_v36, %v361_v60  ;;  %382 = vmax.xlane.f32.xlu1 %v381_v51 }
 0x2bf   :  { %v376_v0 = vsel %vm368_vm15, -1e+30, %v348_v35  ;;  %v377_v1 = vsel %vm369_vm0, -1e+30, %v349_v36  ;;  %385 = vmax.xlane.f32.xlu0 %v384_v63 }
 0x2c0   :  { %v387_v2 = vmax.f32 %v376_v0, %v377_v1 }
 0x2c2   :  { %388 = vmax.xlane.f32.xlu1 %v387_v2 }
 0x347   :  { %v380_v5 = vpop.xlane.xlu0 %379 }
 0x348   :  { %vm390_vm9 = vcmp.eq.f32.partialorder %v370_v39, %v380_v5  ;;  %vm391_vm10 = vcmp.eq.f32.partialorder %v371_v40, %v380_v5 }
 0x349   :  { %v398_v7 = vsel %vm390_vm9, -1e+30, %v370_v39  ;;  %v399_v9 = vsel %vm391_vm10, -1e+30, %v371_v40 }
 0x34a   :  { %v406_v10 = vmax.f32 %v398_v7, %v399_v9 }
 0x34b   :  { %v383_v11 = vpop.xlane.xlu1 %382 }
 0x34c   :  { %vm392_vm11 = vcmp.eq.f32.partialorder %v372_v44, %v383_v11  ;;  %vm393_vm12 = vcmp.eq.f32.partialorder %v373_v45, %v383_v11  ;;  %v386_v12 = vpop.xlane.xlu0 %385  ;;  %407 = vmax.xlane.f32.xlu0 %v406_v10 }
 0x34d   :  { %v400_v13 = vsel %vm392_vm11, -1e+30, %v372_v44  ;;  %v401_v14 = vsel %vm393_vm12, -1e+30, %v373_v45  ;;  %vm394_vm13 = vcmp.eq.f32.partialorder %v374_v46, %v386_v12  ;;  %vm395_vm14 = vcmp.eq.f32.partialorder %v375_v47, %v386_v12 }
 0x34e   :  { %v402_v15 = vsel %vm394_vm13, -1e+30, %v374_v46  ;;  %v403_v16 = vsel %vm395_vm14, -1e+30, %v375_v47  ;;  %v409_v17 = vmax.f32 %v400_v13, %v401_v14 }
 0x34f   :  { %v389_v18 = vpop.xlane.xlu1 %388  ;;  %v412_v19 = vmax.f32 %v402_v15, %v403_v16 }
 0x350   :  { %vm396_vm15 = vcmp.eq.f32.partialorder %v376_v0, %v389_v18  ;;  %vm397_vm0 = vcmp.eq.f32.partialorder %v377_v1, %v389_v18  ;;  %410 = vmax.xlane.f32.xlu1 %v409_v17 }
 0x351   :  { %v404_v20 = vsel %vm396_vm15, -1e+30, %v376_v0  ;;  %v405_v21 = vsel %vm397_vm0, -1e+30, %v377_v1  ;;  %413 = vmax.xlane.f32.xlu0 %v412_v19 }
 0x352   :  { %v415_v22 = vmax.f32 %v404_v20, %v405_v21 }
 0x354   :  { %416 = vmax.xlane.f32.xlu1 %v415_v22 }
 0x3d9   :  { %v408_v23 = vpop.xlane.xlu0 %407 }
 0x3da   :  { %vm418_vm9 = vcmp.eq.f32.partialorder %v398_v7, %v408_v23  ;;  %vm419_vm10 = vcmp.eq.f32.partialorder %v399_v9, %v408_v23 }
 0x3db   :  { %v426_v24 = vsel %vm418_vm9, -1e+30, %v398_v7  ;;  %v427_v25 = vsel %vm419_vm10, -1e+30, %v399_v9 }
 0x3dc   :  { %v434_v26 = vmax.f32 %v426_v24, %v427_v25 }
 0x3dd   :  { %v411_v27 = vpop.xlane.xlu1 %410 }
 0x3de   :  { %vm420_vm11 = vcmp.eq.f32.partialorder %v400_v13, %v411_v27  ;;  %vm421_vm12 = vcmp.eq.f32.partialorder %v401_v14, %v411_v27  ;;  %v414_v28 = vpop.xlane.xlu0 %413  ;;  %435 = vmax.xlane.f32.xlu0 %v434_v26 }
 0x3df   :  { %v428_v29 = vsel %vm420_vm11, -1e+30, %v400_v13  ;;  %v429_v30 = vsel %vm421_vm12, -1e+30, %v401_v14  ;;  %vm422_vm13 = vcmp.eq.f32.partialorder %v402_v15, %v414_v28  ;;  %vm423_vm14 = vcmp.eq.f32.partialorder %v403_v16, %v414_v28 }
 0x3e0   :  { %v430_v31 = vsel %vm422_vm13, -1e+30, %v402_v15  ;;  %v431_v32 = vsel %vm423_vm14, -1e+30, %v403_v16  ;;  %v437_v33 = vmax.f32 %v428_v29, %v429_v30 }
 0x3e1   :  { %v417_v34 = vpop.xlane.xlu1 %416  ;;  %v440_v35 = vmax.f32 %v430_v31, %v431_v32 }
 0x3e2   :  { %vm424_vm15 = vcmp.eq.f32.partialorder %v404_v20, %v417_v34  ;;  %vm425_vm0 = vcmp.eq.f32.partialorder %v405_v21, %v417_v34  ;;  %438 = vmax.xlane.f32.xlu1 %v437_v33  ;;  %v221_v34 = vld [vmem:[%s1225_s5] sm:$0x3] }
 0x3e3   :  { %v432_v36 = vsel %vm424_vm15, -1e+30, %v404_v20  ;;  %v433_v37 = vsel %vm425_vm0, -1e+30, %v405_v21  ;;  %441 = vmax.xlane.f32.xlu0 %v440_v35 }
 0x3e4   :  { %v443_v38 = vmax.f32 %v432_v36, %v433_v37 }
 0x3e6   :  { %444 = vmax.xlane.f32.xlu1 %v443_v38 }
 0x46b   :  { %v436_v39 = vpop.xlane.xlu0 %435 }
 0x46c   :  { %vm446_vm9 = vcmp.eq.f32.partialorder %v426_v24, %v436_v39  ;;  %vm447_vm10 = vcmp.eq.f32.partialorder %v427_v25, %v436_v39 }
 0x46d   :  { %v454_v40 = vsel %vm446_vm9, -1e+30, %v426_v24  ;;  %v455_v41 = vsel %vm447_vm10, -1e+30, %v427_v25  ;;  %v218_v24 = vld [vmem:[%s1223_s3 + $0x8] sm:$0xff]  ;;  %v217_v25 = vld [vmem:[%s1223_s3] sm:$0xff] }
 0x46e   :  { %v462_v42 = vmax.f32 %v454_v40, %v455_v41 }
 0x46f   :  { %v439_v43 = vpop.xlane.xlu1 %438 }
 0x470   :  { %vm448_vm11 = vcmp.eq.f32.partialorder %v428_v29, %v439_v43  ;;  %vm449_vm12 = vcmp.eq.f32.partialorder %v429_v30, %v439_v43  ;;  %v442_v44 = vpop.xlane.xlu0 %441  ;;  %463 = vmax.xlane.f32.xlu0 %v462_v42 }
 0x471   :  { %v456_v45 = vsel %vm448_vm11, -1e+30, %v428_v29  ;;  %v457_v46 = vsel %vm449_vm12, -1e+30, %v429_v30  ;;  %vm450_vm13 = vcmp.eq.f32.partialorder %v430_v31, %v442_v44  ;;  %vm451_vm14 = vcmp.eq.f32.partialorder %v431_v32, %v442_v44 }
 0x472   :  { %v458_v47 = vsel %vm450_vm13, -1e+30, %v430_v31  ;;  %v459_v51 = vsel %vm451_vm14, -1e+30, %v431_v32  ;;  %v465_v60 = vmax.f32 %v456_v45, %v457_v46 }
 0x473   :  { %v445_v63 = vpop.xlane.xlu1 %444  ;;  %v468_v0 = vmax.f32 %v458_v47, %v459_v51 }
 0x474   :  { %vm452_vm15 = vcmp.eq.f32.partialorder %v432_v36, %v445_v63  ;;  %vm453_vm0 = vcmp.eq.f32.partialorder %v433_v37, %v445_v63  ;;  %466 = vmax.xlane.f32.xlu1 %v465_v60 }
 0x475   :  { %v460_v1 = vsel %vm452_vm15, -1e+30, %v432_v36  ;;  %v461_v2 = vsel %vm453_vm0, -1e+30, %v433_v37  ;;  %469 = vmax.xlane.f32.xlu0 %v468_v0 }
 0x476   :  { %v471_v5 = vmax.f32 %v460_v1, %v461_v2 }
 0x478   :  { %472 = vmax.xlane.f32.xlu1 %v471_v5  ;;  %v781_v5 = vmov 0.0  }
 0x4fd   :  { %v464_v7 = vpop.xlane.xlu0 %463 }
 0x4fe   :  { %vm474_vm9 = vcmp.eq.f32.partialorder %v454_v40, %v464_v7  ;;  %vm475_vm10 = vcmp.eq.f32.partialorder %v455_v41, %v464_v7 }
 0x4ff   :  { %v482_v9 = vsel %vm474_vm9, -1e+30, %v454_v40  ;;  %v483_v10 = vsel %vm475_vm10, -1e+30, %v455_v41  ;;  %v1015_v40 = vrot.slane %v221_v34, %v203_v49  ;;  %v1019_v41 = vrot.slane %v221_v34, %v207_v52 }
 0x500   :  { %v490_v11 = vmax.f32 %v482_v9, %v483_v10 }
 0x501   :  { %v467_v12 = vpop.xlane.xlu1 %466 }
 0x502   :  { %vm476_vm11 = vcmp.eq.f32.partialorder %v456_v45, %v467_v12  ;;  %vm477_vm12 = vcmp.eq.f32.partialorder %v457_v46, %v467_v12  ;;  %v470_v13 = vpop.xlane.xlu0 %469  ;;  %491 = vmax.xlane.f32.xlu0 %v490_v11 }
 0x503   :  { %v484_v14 = vsel %vm476_vm11, -1e+30, %v456_v45  ;;  %v485_v15 = vsel %vm477_vm12, -1e+30, %v457_v46  ;;  %vm478_vm13 = vcmp.eq.f32.partialorder %v458_v47, %v470_v13  ;;  %vm479_vm14 = vcmp.eq.f32.partialorder %v459_v51, %v470_v13 }
 0x504   :  { %v486_v16 = vsel %vm478_vm13, -1e+30, %v458_v47  ;;  %v487_v17 = vsel %vm479_vm14, -1e+30, %v459_v51  ;;  %v493_v18 = vmax.f32 %v484_v14, %v485_v15 }
 0x505   :  { %v473_v19 = vpop.xlane.xlu1 %472  ;;  %v496_v20 = vmax.f32 %v486_v16, %v487_v17 }
 0x506   :  { %vm480_vm15 = vcmp.eq.f32.partialorder %v460_v1, %v473_v19  ;;  %vm481_vm0 = vcmp.eq.f32.partialorder %v461_v2, %v473_v19  ;;  %494 = vmax.xlane.f32.xlu1 %v493_v18  ;;  %v681_v18 = vadd.f32 -14.285714, %v951_v8 }
 0x507   :  { %v488_v21 = vsel %vm480_vm15, -1e+30, %v460_v1  ;;  %v489_v22 = vsel %vm481_vm0, -1e+30, %v461_v2  ;;  %497 = vmax.xlane.f32.xlu0 %v496_v20  ;;  %v220_v2 = vld [vmem:[%s1223_s3 + $0x18] sm:$0xff] }
 0x508   :  { %v499_v23 = vmax.f32 %v488_v21, %v489_v22 }
 0x50a   :  { %500 = vmax.xlane.f32.xlu1 %v499_v23 }
 0x51b   :  { %226 = vperm.xlu1 %700, %v218_v24   ;;  %v683_v24 = vadd.f32 -14.285714, %v916_v59 }
 0x51d   :  { %223 = vperm.xlu0 %699, %v217_v25  }
 0x58f   :  { %v492_v26 = vpop.xlane.xlu0 %491 }
 0x590   :  { %vm502_vm9 = vcmp.eq.f32.partialorder %v482_v9, %v492_v26  ;;  %vm503_vm10 = vcmp.eq.f32.partialorder %v483_v10, %v492_v26 }
 0x591   :  { %v992_v27 = vsel %vm502_vm9, -1e+30, %v482_v9  ;;  %v994_v28 = vsel %vm503_vm10, -1e+30, %v483_v10 }
 0x592   :  { %v518_v29 = vmax.f32 %v992_v27, %v994_v28 }
 0x593   :  { %v495_v30 = vpop.xlane.xlu1 %494 }
 0x594   :  { %vm504_vm11 = vcmp.eq.f32.partialorder %v484_v14, %v495_v30  ;;  %vm505_vm12 = vcmp.eq.f32.partialorder %v485_v15, %v495_v30  ;;  %v498_v31 = vpop.xlane.xlu0 %497  ;;  %519 = vmax.xlane.f32.xlu0 %v518_v29 }
 0x595   :  { %v998_v32 = vsel %vm504_vm11, -1e+30, %v484_v14  ;;  %v1000_v33 = vsel %vm505_vm12, -1e+30, %v485_v15  ;;  %vm506_vm13 = vcmp.eq.f32.partialorder %v486_v16, %v498_v31  ;;  %vm507_vm14 = vcmp.eq.f32.partialorder %v487_v17, %v498_v31 }
 0x596   :  { %v1005_v35 = vsel %vm506_vm13, -1e+30, %v486_v16  ;;  %v1007_v36 = vsel %vm507_vm14, -1e+30, %v487_v17  ;;  %v521_v37 = vmax.f32 %v998_v32, %v1000_v33  ;;  %v678_v14 = vadd.f32 -14.285714, %v914_v58 }
 0x597   :  { %v501_v38 = vpop.xlane.xlu1 %500  ;;  %v524_v39 = vmax.f32 %v1005_v35, %v1007_v36  ;;  %v679_v15 = vadd.f32 -14.285714, %v919_v61  ;;  %v680_v16 = vadd.f32 -14.285714, %v938_v3  ;;  %v572_v31 = vmul.f32 1.442695, %v683_v24 }
 0x598   :  { %vm508_vm15 = vcmp.eq.f32.partialorder %v488_v21, %v501_v38  ;;  %vm509_vm0 = vcmp.eq.f32.partialorder %v489_v22, %v501_v38  ;;  %522 = vmax.xlane.f32.xlu1 %v521_v37  ;;  %v562_v17 = vmul.f32 1.442695, %v678_v14 }
 0x599   :  { %v1021_v42 = vsel %vm508_vm15, -1e+30, %v488_v21  ;;  %v1023_v43 = vsel %vm509_vm0, -1e+30, %v489_v22  ;;  %525 = vmax.xlane.f32.xlu0 %v524_v39  ;;  %v564_v19 = vmul.f32 1.442695, %v679_v15 }
 0x59a   :  { %v527_v44 = vmax.f32 %v1021_v42, %v1023_v43  ;;  %v566_v20 = vmul.f32 1.442695, %v680_v16  ;;  %721 = vpow2.f32 %v562_v17  ;;  %v568_v21 = vmul.f32 1.442695, %v681_v18 }
 0x59b   :  { %v227_v45 = vpop.permute.xlu1 %226  ;;  %723 = vpow2.f32 %v564_v19  ;;  %v682_v22 = vadd.f32 -14.285714, %v912_v57 }
 0x59c   :  { %vm244_vm9 = vcmp.ne.s32.totalorder %v227_v45, %v1015_v40  ;;  %vm245_vm10 = vcmp.ne.s32.totalorder %v227_v45, %v1019_v41  ;;  %v224_v46 = vpop.permute.xlu0 %223  ;;  %528 = vmax.xlane.f32.xlu1 %v527_v44  ;;  %725 = vpow2.f32 %v566_v20 }
 0x59d   :  { %vm1032_vm11 = vmand %vm211_vm5, %vm244_vm9  ;;  %vm242_vm12 = vcmp.ne.s32.totalorder %v224_v46, %v1015_v40  ;;  %vm243_vm13 = vcmp.ne.s32.totalorder %v224_v46, %v1019_v41  ;;  %727 = vpow2.f32 %v568_v21  ;;  %v570_v25 = vmul.f32 1.442695, %v682_v22 }
 0x59e   :  { %vm1041_vm14 = vmand %vm212_vm6, %vm245_vm10  ;;  %v288_v52 = vsel %vm1032_vm11, %v938_v3, 0.0  ;;  %v664_v7 = vsel %vm1032_vm11, 1.0, %v781_v5 }
 0x59f   :  { %vm1051_vm5 = vmand %vm209_vm1, %vm242_vm12  ;;  %v289_v51 = vsel %vm1041_vm14, %v951_v8, 0.0  ;;  %v665_v9 = vsel %vm1041_vm14, 1.0, %v781_v5  ;;  %v685_v8 = vadd.f32 -14.285714, %v940_v4  ;;  %729 = vpow2.f32 %v570_v25 }
 0x5a0   :  { %vm1061_vm6 = vmand %vm210_vm2, %vm243_vm13  ;;  %v286_v60 = vsel %vm1051_vm5, %v914_v58, 0.0  ;;  %v1068_v63 = vadd.f32 %v289_v51, %v288_v52  ;;  %v277_v10 = vadd.f32 %v665_v9, %v664_v7  ;;  %v662_v11 = vsel %vm1051_vm5, 1.0, %v781_v5 }
 0x5a1   :  { %v287_v0 = vsel %vm1061_vm6, %v919_v61, 0.0  ;;  %v663_v12 = vsel %vm1061_vm6, 1.0, %v781_v5  ;;  %v684_v58 = vadd.f32 -14.285714, %v923_v62  ;;  %v576_v45 = vmul.f32 1.442695, %v685_v8 }
 0x5a2   :  { %v1073_v1 = vadd.f32 %v287_v0, %v286_v60  ;;  %v274_v13 = vadd.f32 %v663_v12, %v662_v11  ;;  %731 = vpow2.f32 %v572_v31 }
 0x5a3   :  { %v574_v34 = vmul.f32 1.442695, %v684_v58 }
 0x5a4   :  { %v722_v30 = vpop.eup %721 }
 0x5a5   :  { %v724_v44 = vpop.eup %723  ;;  %733 = vpow2.f32 %v574_v34 }
 0x5a6   :  { %v726_v46 = vpop.eup %725  ;;  %735 = vpow2.f32 %v576_v45 }
 0x5ad   :  { %229 = vperm.xlu1 %700, %v219_v55  }
 0x5af   :  { %232 = vperm.xlu0 %699, %v220_v2  }
 0x5ce   :  { %278 = vadd.xlane.f32.xlu0 %v277_v10 }
 0x5d1   :  { %275 = vadd.xlane.f32.xlu1 %v274_v13 }
 0x621   :  { %v520_v23 = vpop.xlane.xlu0 %519 }
 0x622   :  { %vm530_vm1 = vcmp.eq.f32.partialorder %v992_v27, %v520_v23  ;;  %vm531_vm2 = vcmp.eq.f32.partialorder %v994_v28, %v520_v23 }
 0x623   :  { %v538_v61 = vsel %vm530_vm1, -1e+30, %v992_v27  ;;  %v539_v3 = vsel %vm531_vm2, -1e+30, %v994_v28 }
 0x624   :  { %vm546_vm15 = vcmp.eq.f32.partialorder %v538_v61, -1e+30  ;;  %vm547_vm0 = vcmp.eq.f32.partialorder %v539_v3, -1e+30 }
 0x625   :  { %v523_v26 = vpop.xlane.xlu1 %522  ;;  %vm1107_vm9 = vmor %vm1051_vm5, %vm546_vm15 }
 0x626   :  { %vm532_vm10 = vcmp.eq.f32.partialorder %v998_v32, %v523_v26  ;;  %vm533_vm12 = vcmp.eq.f32.partialorder %v1000_v33, %v523_v26  ;;  %vm1115_vm13 = vmor %vm1061_vm6, %vm547_vm0  ;;  %v526_v38 = vpop.xlane.xlu0 %525  ;;  %v586_v39 = vsel %vm1107_vm9, %v722_v30, 0.0 }
 0x627   :  { %v540_v28 = vsel %vm532_vm10, -1e+30, %v998_v32  ;;  %v541_v37 = vsel %vm533_vm12, -1e+30, %v1000_v33  ;;  %v587_v47 = vsel %vm1115_vm13, %v724_v44, 0.0  ;;  %v728_v32 = vpop.eup %727  ;;  %vm534_vm2 = vcmp.eq.f32.partialorder %v1005_v35, %v526_v38 }
 0x628   :  { %vm548_vm5 = vcmp.eq.f32.partialorder %v540_v28, -1e+30  ;;  %vm549_vm1 = vcmp.eq.f32.partialorder %v541_v37, -1e+30  ;;  %v594_v33 = vadd.f32 %v587_v47, %v586_v39  ;;  %vm535_vm0 = vcmp.eq.f32.partialorder %v1007_v36, %v526_v38  ;;  %v730_v12 = vpop.eup %729 }
 0x629   :  { %v529_v52 = vpop.xlane.xlu1 %528  ;;  %vm580_vm6 = vmor %vm1032_vm11, %vm548_vm5  ;;  %v542_v0 = vsel %vm534_vm2, -1e+30, %v1005_v35  ;;  %v543_v35 = vsel %vm535_vm0, -1e+30, %v1007_v36  ;;  %v732_v6 = vpop.eup %731 }
 0x62a   :  { %vm581_vm15 = vmor %vm1041_vm14, %vm549_vm1  ;;  %v588_v51 = vsel %vm580_vm6, %v726_v46, 0.0  ;;  %vm536_vm11 = vcmp.eq.f32.partialorder %v1021_v42, %v529_v52  ;;  %vm537_vm9 = vcmp.eq.f32.partialorder %v1023_v43, %v529_v52  ;;  %vm550_vm1 = vcmp.eq.f32.partialorder %v542_v0, -1e+30  ;;  %v734_v15 = vpop.eup %733 }
 0x62b   :  { %v589_v50 = vsel %vm581_vm15, %v728_v32, 0.0  ;;  %v545_v36 = vsel %vm537_vm9, -1e+30, %v1023_v43  ;;  %v736_v16 = vpop.eup %735 }
 0x62c   :  { %v597_v60 = vadd.f32 %v589_v50, %v588_v51  ;;  %vm553_vm0 = vcmp.eq.f32.partialorder %v545_v36, -1e+30 }
 0x62d   :  { %v230_v55 = vpop.permute.xlu1 %229 }
 0x62e   :  { %vm246_vm10 = vcmp.ne.s32.totalorder %v230_v55, %v1015_v40  ;;  %vm247_vm12 = vcmp.ne.s32.totalorder %v230_v55, %v1019_v41  ;;  %v233_v48 = vpop.permute.xlu0 %232 }
 0x62f   :  { %vm1139_vm14 = vmand %vm213_vm3, %vm246_vm10  ;;  %vm248_vm13 = vcmp.ne.s32.totalorder %v233_v48, %v1015_v40  ;;  %vm249_vm5 = vcmp.ne.s32.totalorder %v233_v48, %v1019_v41  ;;  %v544_v41 = vsel %vm536_vm11, -1e+30, %v1021_v42 }
 0x630   :  { %vm1149_vm6 = vmand %vm214_vm4, %vm247_vm12  ;;  %v666_v7 = vsel %vm1139_vm14, 1.0, %v781_v5  ;;  %v290_v40 = vsel %vm1139_vm14, %v912_v57, 0.0  ;;  %vm552_vm2 = vcmp.eq.f32.partialorder %v544_v41, -1e+30  ;;  %vm642_vm12 = vcmask 7168  }
 0x631   :  { %vm1164_vm3 = vmand %vm215_vm7, %vm248_vm13  ;;  %v667_v9 = vsel %vm1149_vm6, 1.0, %v781_v5  ;;  %v291_v10 = vsel %vm1149_vm6, %v916_v59, 0.0  ;;  %vm551_vm7 = vcmp.eq.f32.partialorder %v543_v35, -1e+30 }
 0x632   :  { %vm1177_vm4 = vmand %vm216_vm8, %vm249_vm5  ;;  %v280_v53 = vadd.f32 %v667_v9, %v666_v7  ;;  %v668_v42 = vsel %vm1164_vm3, 1.0, %v781_v5  ;;  %v300_v43 = vadd.f32 %v291_v10, %v290_v40  ;;  %v292_v11 = vsel %vm1164_vm3, %v923_v62, 0.0 }
 0x633   :  { %v669_v54 = vsel %vm1177_vm4, 1.0, %v781_v5  ;;  %vm582_vm8 = vmor %vm1139_vm14, %vm550_vm1  ;;  %v293_v59 = vsel %vm1177_vm4, %v940_v4, 0.0 }
 0x634   :  { %281 = vadd.xlane.f32.xlu0 %v280_v53  ;;  %v283_v13 = vadd.f32 %v669_v54, %v668_v42  ;;  %vm583_vm15 = vmor %vm1149_vm6, %vm551_vm7  ;;  %v590_v62 = vsel %vm582_vm8, %v730_v12, 0.0  ;;  %v303_v14 = vadd.f32 %v293_v59, %v292_v11 }
 0x635   :  { %v591_v5 = vsel %vm583_vm15, %v732_v6, 0.0  ;;  %vm584_vm11 = vmor %vm1164_vm3, %vm552_vm2 }
 0x636   :  { %284 = vadd.xlane.f32.xlu1 %v283_v13  ;;  %v600_v17 = vadd.f32 %v591_v5, %v590_v62  ;;  %vm585_vm9 = vmor %vm1177_vm4, %vm553_vm0  ;;  %v592_v4 = vsel %vm584_vm11, %v734_v15, 0.0 }
 0x637   :  { %v593_v18 = vsel %vm585_vm9, %v736_v16, 0.0 }
 0x638   :  { %595 = vadd.xlane.f32.xlu0 %v594_v33  ;;  %v603_v19 = vadd.f32 %v593_v18, %v592_v4 }
 0x63a   :  { %598 = vadd.xlane.f32.xlu1 %v597_v60 }
 0x63c   :  { %601 = vadd.xlane.f32.xlu0 %v600_v17 }
 0x63e   :  { %604 = vadd.xlane.f32.xlu1 %v603_v19 }
 0x640   :  { %295 = vadd.xlane.f32.xlu0 %v1073_v1 }
 0x642   :  { %298 = vadd.xlane.f32.xlu1 %v1068_v63 }
 0x644   :  { %301 = vadd.xlane.f32.xlu0 %v300_v43 }
 0x646   :  { %304 = vadd.xlane.f32.xlu1 %v303_v14 }
 0x65b   :  { %v279_v20 = vpop.xlane.xlu0 %278 }
 0x65c   :  { %v623_v23 = vmax.f32 %v279_v20, 1.0  ;;  %vm619_vm14 = vcmp.gt.f32.partialorder %v279_v20, 0.0 }
 0x65e   :  { %v276_v21 = vpop.xlane.xlu1 %275  ;;  %737 = vrcp.f32 %v623_v23 }
 0x65f   :  { %v622_v58 = vmax.f32 %v276_v21, 1.0  ;;  %vm618_vm10 = vcmp.gt.f32.partialorder %v276_v21, 0.0 }
 0x668   :  { %v738_v29 = vpop.eup %737 }
 0x6c1   :  { %v282_v22 = vpop.xlane.xlu0 %281 }
 0x6c2   :  { %v624_v3 = vmax.f32 %v282_v22, 1.0  ;;  %vm620_vm13 = vcmp.gt.f32.partialorder %v282_v22, 0.0 }
 0x6c3   :  { %v285_v24 = vpop.xlane.xlu1 %284 }
 0x6c4   :  { %v625_v26 = vmax.f32 %v285_v24, 1.0  ;;  %vm621_vm5 = vcmp.gt.f32.partialorder %v285_v24, 0.0 }
 0x6c5   :  { %v596_v61 = vpop.xlane.xlu0 %595 }
 0x6c6   :  { %739 = vlog2.f32 %v596_v61 }
 0x6c7   :  { %v599_v8 = vpop.xlane.xlu1 %598 }
 0x6c8   :  { %741 = vlog2.f32 %v599_v8 }
 0x6c9   :  { %743 = vrcp.f32 %v622_v58  ;;  %v602_v25 = vpop.xlane.xlu0 %601 }
 0x6ca   :  { %745 = vlog2.f32 %v602_v25 }
 0x6cb   :  { %747 = vrcp.f32 %v624_v3  ;;  %v605_v63 = vpop.xlane.xlu1 %604 }
 0x6cc   :  { %749 = vlog2.f32 %v605_v63 }
 0x6cd   :  { %751 = vrcp.f32 %v625_v26  ;;  %v296_v1 = vpop.xlane.xlu0 %295 }
 0x6cf   :  { %v299_v30 = vpop.xlane.xlu1 %298 }
 0x6d0   :  { %v740_v31 = vpop.eup %739  ;;  %v629_v32 = vmul.f32 %v738_v29, %v299_v30 }
 0x6d1   :  { %v607_v27 = vmul.f32 0.6931472, %v740_v31  ;;  %v302_v45 = vpop.xlane.xlu0 %301 }
 0x6d2   :  { %v742_v34 = vpop.eup %741 }
 0x6d3   :  { %v744_v28 = vpop.eup %743  ;;  %v609_v37 = vmul.f32 0.6931472, %v742_v34  ;;  %v614_v39 = vadd.f32 14.285714, %v607_v27  ;;  %v305_v50 = vpop.xlane.xlu1 %304 }
 0x6d4   :  { %v746_v38 = vpop.eup %745  ;;  %v627_v44 = vmul.f32 %v744_v28, %v296_v1 }
 0x6d5   :  { %v748_v46 = vpop.eup %747  ;;  %v615_v52 = vadd.f32 14.285714, %v609_v37  ;;  %v611_v47 = vmul.f32 0.6931472, %v746_v38 }
 0x6d6   :  { %v750_v33 = vpop.eup %749  ;;  %v634_v51 = vsub.f32 %v614_v39, %v627_v44  ;;  %v631_v48 = vmul.f32 %v748_v46, %v302_v45 }
 0x6d7   :  { %v613_v60 = vmul.f32 0.6931472, %v750_v33  ;;  %v616_v0 = vadd.f32 14.285714, %v611_v47  ;;  %v635_v55 = vsub.f32 %v615_v52, %v629_v32  ;;  %v752_v49 = vpop.eup %751 }
 0x6d8   :  { %v638_v35 = vsel %vm618_vm10, %v634_v51, 0.0  ;;  %v633_v40 = vmul.f32 %v752_v49, %v305_v50 }
 0x6d9   :  { %v617_v2 = vadd.f32 14.285714, %v613_v60  ;;  %v639_v7 = vsel %vm619_vm14, %v635_v55, 0.0  ;;  %643 = vst.msk [vmem:[%s1226_s6] sm:$0xff] %vm642_vm12, %v638_v35  ;;  %v636_v41 = vsub.f32 %v616_v0, %v631_v48 }
 0x6da   :  { %644 = vst.msk [vmem:[%s1226_s6 + $0x8] sm:$0xff] %vm642_vm12, %v639_v7 }
 0x6db   :  { %v637_v36 = vsub.f32 %v617_v2, %v633_v40  ;;  %v640_v56 = vsel %vm620_vm13, %v636_v41, 0.0 }
 0x6dc   :  { %645 = vst.msk [vmem:[%s1226_s6 + $0x10] sm:$0xff] %vm642_vm12, %v640_v56 }
 0x6dd   :  { %v641_v9 = vsel %vm621_vm5, %v637_v36, 0.0 }
 0x6de   :  { %646 = vst.msk [vmem:[%s1226_s6 + $0x18] sm:$0xff] %vm642_vm12, %v641_v9 }
 0x6df   :  { %651 = vsyncpa [#allocation3], 1 }

</bundles_post_ra>
